<compile_context>
chip_gen: v5e
topology: v5e:2x2
jax: 0.10.0
libtpu: 0.0.40
codegen_flags: <defaults>
</compile_context>

<pallas_src>
import math

import numpy as np
import jax
import jax.numpy as jnp
from jax import lax
from jax.experimental import pallas as pl
from jax.experimental.pallas import tpu as pltpu


# ---------------------------------------------------------------------------
# Kernel 1: bidirectional GRU with fused, gate-major, block-diagonal weights.
#   emb_ref : (T, nt, E)  bf16    (T = document axis = recurrence length)
#   wih_ref : (E, 6H)     f32     [Wr_f Wr_b | Wz_f Wz_b | Wn_f Wn_b]
#   bias_ref: (1, 6H)     f32     input biases, r/z hidden biases folded in
#   whh_ref : (2H, 6H)    f32     block-diag: forward rows -> f cols, backward -> b cols
#   bhn_ref : (1, 2H)     f32     n-gate hidden bias [bhn_f | bhn_b]
#   y_ref   : (T, nt, 2H) bf16    [forward | backward] hidden states
# ---------------------------------------------------------------------------
def bigru_kernel(emb_ref, wih_ref, bias_ref, whh_ref, bhn_ref, y_ref, xg_s):
    T, nt, E = emb_ref.shape
    H2, G = whh_ref.shape          # (2H, 6H)
    H = H2 // 2

    # ---- hoisted input projection for BOTH directions (one MXU pass, no HBM xg) ----
    emb = emb_ref[...].astype(jnp.float32).reshape(T * nt, E)
    xg = jnp.dot(emb, wih_ref[...], preferred_element_type=jnp.float32) + bias_ref[...]
    xg_s[...] = xg.reshape(T, nt, G)

    # hoisted loop-invariants (JAX does not CSE broadcasts inside fori_loop)
    whh = whh_ref[...]                                    # (2H, 6H)
    bhn = jnp.broadcast_to(bhn_ref[...], (nt, H2))        # (nt, 2H)
    col = lax.broadcasted_iota(jnp.int32, (nt, G), 1)
    fmask = (col % H2) < H                                # True on forward-direction cols

    def step(i, h):                                       # h = [h_f | h_b]  (nt, 2H) f32
        tb = T - 1 - i
        # forward gates use time i, backward gates use time T-1-i (pure VPU select)
        xg_t = jnp.where(fmask, xg_s[i], xg_s[tb])        # (nt, 6H)
        gh = jnp.dot(h, whh, preferred_element_type=jnp.float32)   # ONE fused MXU push
        r = jax.nn.sigmoid(xg_t[:, 0:H2] + gh[:, 0:H2])
        z = jax.nn.sigmoid(xg_t[:, H2:2 * H2] + gh[:, H2:2 * H2])
        n = jnp.tanh(xg_t[:, 2 * H2:3 * H2] + r * (gh[:, 2 * H2:3 * H2] + bhn))
        h = n + z * (h - n)                               # == (1-z)*n + z*h
        y_ref[i, :, :H] = h[:, :H].astype(y_ref.dtype)    # forward half at time i
        y_ref[tb, :, H:] = h[:, H:].astype(y_ref.dtype)   # backward half at time T-1-i
        return h

    lax.fori_loop(0, T, step, jnp.zeros((nt, H2), jnp.float32), unroll=T <= 32)


def bigru(emb_t, wih_gm, bias_gm, whh_bd, bhn_cat):
    T, N, E = emb_t.shape
    H2, G = whh_bd.shape
    # TODO(synk): on v7x split N into >=2 tiles (multiples of 8) so the 'parallel' axis
    #             shards across both TensorCores and the block fits 64 MiB VMEM at scale.
    nt = N
    return pl.pallas_call(
        bigru_kernel,
        out_shape=jax.ShapeDtypeStruct((T, N, H2), jnp.bfloat16),
        grid=(N // nt,),
        in_specs=[
            pl.BlockSpec((T, nt, E), lambda j: (0, j, 0)),
            pl.BlockSpec((E, G), lambda j: (0, 0)),
            pl.BlockSpec((1, G), lambda j: (0, 0)),
            pl.BlockSpec((H2, G), lambda j: (0, 0)),
            pl.BlockSpec((1, H2), lambda j: (0, 0)),
        ],
        out_specs=pl.BlockSpec((T, nt, H2), lambda j: (0, j, 0)),
        scratch_shapes=[pltpu.VMEM((T, nt, G), jnp.float32)],
        compiler_params=pltpu.CompilerParams(
            dimension_semantics=("parallel",),
            vmem_limit_bytes=64 * 1024 * 1024),
    )(emb_t, wih_gm, bias_gm, whh_bd, bhn_cat)


# ---------------------------------------------------------------------------
# Kernel 2: SummaRuNNer-style scoring, all documents batched per grid step.
# ---------------------------------------------------------------------------
def score_kernel(sents_ref, mw_ref, fdoc_wT_ref, fdoc_b_ref, sal_wT_ref,
                 content_w_ref, nov_w_ref, posb_ref, out_ref, hn_s, pre_s):
    nb, S, H2 = sents_ref.shape
    x = sents_ref[...].astype(jnp.float32)                # (nb, S, 2H)

    # ---- hoisted per-document work (off the serial summ chain) ----
    mean = jnp.sum(x * mw_ref[...], axis=1)               # masked mean (exact 1/L weights)
    doc = jnp.tanh(jnp.dot(mean, fdoc_wT_ref[...],
                           preferred_element_type=jnp.float32) + fdoc_b_ref[...])  # (nb,2H)
    # content + salience fused:  h.(sal_w@doc) + h.c  ==  h.(sal_w@doc + c)
    w_cs = jnp.dot(doc, sal_wT_ref[...],
                   preferred_element_type=jnp.float32) + content_w_ref[...]        # (nb,2H)
    pre_s[...] = (jnp.sum(x * w_cs[:, None, :], axis=-1, keepdims=True)
                  + posb_ref[...][None])                  # content+salience+abs_pos+bias
    hn_s[...] = jnp.dot(x.reshape(nb * S, H2), nov_w_ref[...],
                        preferred_element_type=jnp.float32).reshape(nb, S, H2)

    # ---- serial summ recurrence, vectorized over the nb docs of this block ----
    lane = lax.broadcasted_iota(jnp.int32, (1, 1, S), 2)

    def step(t, carry):
        summ, prow = carry                                # (nb,1,2H), (nb,1,S)
        hn_t = hn_s[:, pl.ds(t, 1), :]                    # (nb,1,2H)
        nov = -jnp.sum(hn_t * jnp.tanh(summ), axis=-1, keepdims=True)   # (nb,1,1)
        prob = jax.nn.sigmoid(pre_s[:, pl.ds(t, 1), :] + nov)           # (nb,1,1)
        x_t = sents_ref[:, pl.ds(t, 1), :].astype(jnp.float32)
        summ = summ + prob * x_t                          # torch.mm(prob, h), batched
        prow = prow + jnp.where(lane == t, prob, 0.0)
        return summ, prow

    # TODO(synk): for long ragged docs, bound this loop by the block's max length.
    carry0 = (jnp.zeros((nb, 1, H2), jnp.float32), jnp.zeros((nb, 1, S), jnp.float32))
    _, prow = lax.fori_loop(0, S, step, carry0, unroll=True if S <= 32 else 4)
    out_ref[...] = prow                                   # one lane-dense store per block


def score_docs(sents, mean_w, fdoc_wT, fdoc_b, sal_wT, content_w, nov_w, posb):
    B, S, H2 = sents.shape
    # TODO(synk): for large B use nb ~= ceil(B/2) blocks so both v7x TensorCores stay busy.
    nb = B
    return pl.pallas_call(
        score_kernel,
        out_shape=jax.ShapeDtypeStruct((B, 1, S), jnp.float32),
        grid=(B // nb,),
        in_specs=[
            pl.BlockSpec((nb, S, H2), lambda j: (j, 0, 0)),   # sentence hiddens (bf16)
            pl.BlockSpec((nb, S, 1), lambda j: (j, 0, 0)),    # masked-mean weights
            pl.BlockSpec((H2, H2), lambda j: (0, 0)),         # fdoc W^T
            pl.BlockSpec((1, H2), lambda j: (0, 0)),          # fdoc bias
            pl.BlockSpec((H2, H2), lambda j: (0, 0)),         # salience bilinear W^T
            pl.BlockSpec((1, H2), lambda j: (0, 0)),          # content weight
            pl.BlockSpec((H2, H2), lambda j: (0, 0)),         # novelty bilinear W
            pl.BlockSpec((S, 1), lambda j: (0, 0)),           # abs-pos score + bias
        ],
        out_specs=pl.BlockSpec((nb, 1, S), lambda j: (j, 0, 0)),
        scratch_shapes=[pltpu.VMEM((nb, S, H2), jnp.float32),   # x @ nov_w
                        pltpu.VMEM((nb, S, 1), jnp.float32)],   # content+sal+pos+bias
        compiler_params=pltpu.CompilerParams(
            dimension_semantics=("parallel",),
            vmem_limit_bytes=64 * 1024 * 1024),
    )(sents, mean_w, fdoc_wT, fdoc_b, sal_wT, content_w, nov_w, posb)


# ---------------------------------------------------------------------------
# Full forward (glue + kernels)
# ---------------------------------------------------------------------------
def sentbert_rnn_forward(emb, lengths, p):
    # emb: (S, B, E) seq-major (pad_sequence layout); lengths: static python ints
    S, B, _ = emb.shape
    H = p["whh_f"].shape[2]
    H2 = 2 * H

    # ---- GRU weights, gate-major interleaved ([r_f r_b | z_f z_b | n_f n_b]) ----
    wih_gm = jnp.concatenate([p["wih_f"][0], p["wih_b"][0],
                              p["wih_f"][1], p["wih_b"][1],
                              p["wih_f"][2], p["wih_b"][2]], axis=1)          # (E, 6H)
    bias_gm = jnp.concatenate([
        p["bih_f"][0] + p["bhh_f"][0], p["bih_b"][0] + p["bhh_b"][0],
        p["bih_f"][1] + p["bhh_f"][1], p["bih_b"][1] + p["bhh_b"][1],
        p["bih_f"][2], p["bih_b"][2]])[None, :]                               # (1, 6H)
    Z = jnp.zeros((H, H), jnp.float32)
    whh_bd = jnp.concatenate([
        jnp.concatenate([p["whh_f"][0], Z, p["whh_f"][1], Z, p["whh_f"][2], Z], axis=1),
        jnp.concatenate([Z, p["whh_b"][0], Z, p["whh_b"][1], Z, p["whh_b"][2]], axis=1),
    ], axis=0)                                                                # (2H, 6H)
    bhn_cat = jnp.concatenate([p["bhh_f"][2], p["bhh_b"][2]])[None, :]        # (1, 2H)

    # batch_first quirk: recurrence runs over the document axis B, batch = positions S.
    emb_t = jnp.transpose(emb, (1, 0, 2)).astype(jnp.bfloat16)                # (B, S, E)

    sents = bigru(emb_t, wih_gm, bias_gm, whh_bd, bhn_cat)                    # (B, S, 2H) bf16

    # ---- scoring parameters ----
    fdoc_wT = p["fdoc_w"].T
    fdoc_b = p["fdoc_b"][None, :]
    sal_wT = p["sal_w"][0].T
    nov_w = p["nov_w"][0]
    pos_idx = jnp.minimum(jnp.arange(S), p["emb_table"].shape[0] - 1)         # min(999, pos)
    posb = (p["emb_table"][pos_idx] @ p["abs_pos_w"][0] + p["bias"][0])[:, None]   # (S, 1)

    # exact masked-mean weights from the static lengths (host-side, no approx reciprocal)
    lengths_np = np.asarray(lengths)
    mw_np = (np.arange(S)[None, :] < lengths_np[:, None]).astype(np.float32)
    mw_np = mw_np / np.maximum(lengths_np, 1)[:, None].astype(np.float32)
    mean_w = jnp.asarray(mw_np)[:, :, None]                                   # (B, S, 1)

    probs = score_docs(sents, mean_w, fdoc_wT, fdoc_b, sal_wT,
                       p["content_w"], nov_w, posb)                           # (B, 1, S)

    # torch.cat(probs).squeeze(): one vectorized ragged gather (lengths are static)
    valid = np.arange(S)[None, :] < lengths_np[:, None]
    return probs.reshape(B * S)[np.flatnonzero(valid.reshape(-1))]


# ---------------------------------------------------------------------------
# Pure-JAX reference (same math, no Pallas) for validation
# ---------------------------------------------------------------------------
def reference_forward(emb, lengths, p):
    S, B, _ = emb.shape
    H = p["whh_f"].shape[2]
    x_tm = jnp.transpose(emb, (1, 0, 2))

    def gru_dir(x, wih, whh, bih, bhh, reverse):
        def step(h, x_t):
            r = jax.nn.sigmoid(x_t @ wih[0] + bih[0] + h @ whh[0] + bhh[0])
            z = jax.nn.sigmoid(x_t @ wih[1] + bih[1] + h @ whh[1] + bhh[1])
            n = jnp.tanh(x_t @ wih[2] + bih[2] + r * (h @ whh[2] + bhh[2]))
            h_new = (1.0 - z) * n + z * h
            return h_new, h_new
        xs = x[::-1] if reverse else x
        _, ys = lax.scan(step, jnp.zeros((x.shape[1], H), jnp.float32), xs)
        return ys[::-1] if reverse else ys

    yf = gru_dir(x_tm, p["wih_f"], p["whh_f"], p["bih_f"], p["bhh_f"], False)
    yb = gru_dir(x_tm, p["wih_b"], p["whh_b"], p["bih_b"], p["bhh_b"], True)
    sents_bsd = jnp.concatenate([yf, yb], axis=-1)

    probs = []
    for i in range(B):
        L = int(lengths[i])
        vh = sents_bsd[i, :L]
        doc = jnp.tanh(vh.mean(axis=0) @ p["fdoc_w"].T + p["fdoc_b"])
        summ = jnp.zeros((2 * H,), jnp.float32)
        for pos in range(L):
            h = vh[pos]
            content = jnp.dot(h, p["content_w"][0])
            sal = jnp.dot(h @ p["sal_w"][0], doc)
            nov = -jnp.dot(h @ p["nov_w"][0], jnp.tanh(summ))
            absp = jnp.dot(p["emb_table"][min(999, pos)], p["abs_pos_w"][0])
            prob = jax.nn.sigmoid(content + sal + nov + absp + p["bias"][0])
            summ = summ + prob * h
            probs.append(prob)
    return jnp.stack(probs)


# ---------------------------------------------------------------------------
# Deterministic parameter init (shapes from SentBERT_RNN.__init__)
# ---------------------------------------------------------------------------
def init_params(key, E, H, PD, PV):
    ks = jax.random.split(key, 16)
    H2 = 2 * H

    def u(k, shape, fan):
        s = 1.0 / math.sqrt(fan)
        return jax.random.uniform(k, shape, jnp.float32, -s, s)

    return dict(
        # GRU (gate order r, z, n), stored pre-transposed: wih[g] = W_i{g}.T  (E,H)
        wih_f=u(ks[0], (3, E, H), H), whh_f=u(ks[1], (3, H, H), H),
        bih_f=u(ks[2], (3, H), H), bhh_f=u(ks[3], (3, H), H),
        wih_b=u(ks[4], (3, E, H), H), whh_b=u(ks[5], (3, H, H), H),
        bih_b=u(ks[6], (3, H), H), bhh_b=u(ks[7], (3, H), H),
        fdoc_w=u(ks[8], (H2, H2), H2), fdoc_b=u(ks[9], (H2,), H2),
        emb_table=jax.random.normal(ks[10], (PV, PD), jnp.float32),   # abs_pos_embed
        content_w=u(ks[11], (1, H2), H2),                             # Linear(2H,1,bias=False)
        sal_w=u(ks[12], (1, H2, H2), H2),                             # Bilinear(2H,2H,1)
        nov_w=u(ks[13], (1, H2, H2), H2),                             # Bilinear(2H,2H,1)
        abs_pos_w=u(ks[14], (1, PD), PD),                             # Linear(P_D,1,bias=False)
        bias=jax.random.uniform(ks[15], (1,), jnp.float32, -0.1, 0.1),
    )


if __name__ == "__main__":
    E, H, PD, PV = 128, 64, 16, 1000     # emb dim, hidden, pos_dim, pos_num
    lengths = [5, 8, 6]                  # sentences per document (static)
    B = len(lengths)
    S = max(lengths)

    key = jax.random.PRNGKey(0)
    kp, kx = jax.random.split(key)
    p = init_params(kp, E, H, PD, PV)

    emb = jax.random.normal(kx, (S, B, E), jnp.float32)
    pad_mask = (jnp.arange(S)[:, None] < jnp.asarray(lengths)[None, :]).astype(jnp.float32)
    emb = emb * pad_mask[:, :, None]     # zero the padded slots, like pad_sequence

    out = jax.block_until_ready(sentbert_rnn_forward(emb, lengths, p))
    ref = jax.block_until_ready(reference_forward(emb, lengths, p))

    assert out.shape == (sum(lengths),)
    assert bool(jnp.allclose(out, ref, atol=2e-2, rtol=2e-2)), (out, ref)
    print("KERNEL_OK")
</pallas_src>

<mosaic_0001>
module attributes {stable_mosaic.version = 11 : i64} {
  func.func @bigru_kernel(%arg0: i32, %arg1: memref<3x8x128xbf16, #tpu.memory_space<vmem>>, %arg2: memref<128x384xf32, #tpu.memory_space<vmem>>, %arg3: memref<1x384xf32, #tpu.memory_space<vmem>>, %arg4: memref<128x384xf32, #tpu.memory_space<vmem>>, %arg5: memref<1x128xf32, #tpu.memory_space<vmem>>, %arg6: memref<3x8x128xbf16, #tpu.memory_space<vmem>>, %arg7: memref<3x8x384xf32, #tpu.memory_space<vmem>>) attributes {dimension_semantics = [#tpu.dimension_semantics<parallel>], iteration_bounds = array<i64: 1>, scalar_prefetch = 0 : i64, scratch_operands = 1 : i64, tpu.core_type = #tpu.core_type<tc>, window_params = [{transform_indices = @transform_0, window_bounds = array<i64: 3, 8, 128>}, {pipeline_mode = #tpu.pipeline_mode<synchronous>, transform_indices = @transform_1, window_bounds = array<i64: 128, 384>}, {pipeline_mode = #tpu.pipeline_mode<synchronous>, transform_indices = @transform_2, window_bounds = array<i64: 1, 384>}, {pipeline_mode = #tpu.pipeline_mode<synchronous>, transform_indices = @transform_3, window_bounds = array<i64: 128, 384>}, {pipeline_mode = #tpu.pipeline_mode<synchronous>, transform_indices = @transform_4, window_bounds = array<i64: 1, 128>}, {transform_indices = @transform_5, window_bounds = array<i64: 3, 8, 128>}]} {
    %c0 = arith.constant 0 : index
    %c0_0 = arith.constant 0 : index
    %c0_1 = arith.constant 0 : index
    %0 = vector.load %arg1[%c0, %c0_0, %c0_1] : memref<3x8x128xbf16, #tpu.memory_space<vmem>>, vector<3x8x128xbf16>
    %1 = arith.extf %0 : vector<3x8x128xbf16> to vector<3x8x128xf32>
    %2 = vector.shape_cast %1 : vector<3x8x128xf32> to vector<24x128xf32>
    %c0_2 = arith.constant 0 : index
    %c0_3 = arith.constant 0 : index
    %3 = vector.load %arg2[%c0_2, %c0_3] : memref<128x384xf32, #tpu.memory_space<vmem>>, vector<128x384xf32>
    %cst = arith.constant dense<0.000000e+00> : vector<24x384xf32>
    %4 = tpu.matmul %2, %3, %cst {dimension_numbers = #tpu.dot_dimension_numbers<[1], [0], [0], [1], [0, 0, 1, 1], [], []>} : vector<24x128xf32>, vector<128x384xf32>, vector<24x384xf32> -> vector<24x384xf32>
    %c0_4 = arith.constant 0 : index
    %c0_5 = arith.constant 0 : index
    %5 = vector.load %arg3[%c0_4, %c0_5] : memref<1x384xf32, #tpu.memory_space<vmem>>, vector<1x384xf32>
    %6 = vector.broadcast %5 : vector<1x384xf32> to vector<24x384xf32>
    %7 = arith.addf %4, %6 : vector<24x384xf32>
    %8 = vector.shape_cast %7 : vector<24x384xf32> to vector<3x8x384xf32>
    %c0_6 = arith.constant 0 : index
    %c0_7 = arith.constant 0 : index
    %c0_8 = arith.constant 0 : index
    %9 = vector.load %arg7[%c0_6, %c0_7, %c0_8] : memref<3x8x384xf32, #tpu.memory_space<vmem>>, vector<3x8x384xf32>
    tpu.vector_store %arg7[%c0_6, %c0_7, %c0_8], %8 {strides = array<i32>} : memref<3x8x384xf32, #tpu.memory_space<vmem>>, vector<3x8x384xf32>,
    %c0_9 = arith.constant 0 : index
    %c0_10 = arith.constant 0 : index
    %10 = vector.load %arg4[%c0_9, %c0_10] : memref<128x384xf32, #tpu.memory_space<vmem>>, vector<128x384xf32>
    %c0_11 = arith.constant 0 : index
    %c0_12 = arith.constant 0 : index
    %11 = vector.load %arg5[%c0_11, %c0_12] : memref<1x128xf32, #tpu.memory_space<vmem>>, vector<1x128xf32>
    %12 = vector.shape_cast %11 : vector<1x128xf32> to vector<1x128xf32>
    %13 = vector.broadcast %12 : vector<1x128xf32> to vector<8x128xf32>
    %14 = tpu.iota {dimensions = array<i32: 1>} : vector<8x384xi32>
    %c128_i32 = arith.constant 128 : i32
    %c0_i32 = arith.constant 0 : i32
    %15 = arith.cmpi eq, %c128_i32, %c0_i32 : i32
    %c1_i32 = arith.constant 1 : i32
    %16 = arith.select %15, %c1_i32, %c128_i32 : i32
    %17 = vector.broadcast %16 : i32 to vector<8x384xi32>
    %18 = arith.remsi %14, %17 : vector<8x384xi32>
    %c0_i32_13 = arith.constant 0 : i32
    %19 = vector.broadcast %c0_i32_13 : i32 to vector<8x384xi32>
    %20 = arith.cmpi ne, %18, %19 : vector<8x384xi32>
    %c0_i32_14 = arith.constant 0 : i32
    %21 = vector.broadcast %c0_i32_14 : i32 to vector<8x384xi32>
    %22 = arith.cmpi slt, %18, %21 : vector<8x384xi32>
    %c0_i32_15 = arith.constant 0 : i32
    %23 = arith.cmpi slt, %16, %c0_i32_15 : i32
    %24 = vector.broadcast %23 : i1 to vector<8x384xi1>
    %25 = vector.broadcast %24 : vector<8x384xi1> to vector<8x384xi1>
    %26 = arith.xori %22, %25 : vector<8x384xi1>
    %27 = arith.andi %26, %20 : vector<8x384xi1>
    %28 = vector.broadcast %16 : i32 to vector<8x384xi32>
    %29 = arith.addi %18, %28 : vector<8x384xi32>
    %30 = arith.select %27, %29, %18 : vector<8x384xi1>, vector<8x384xi32>
    %c64_i32 = arith.constant 64 : i32
    %31 = vector.broadcast %c64_i32 : i32 to vector<8x384xi32>
    %32 = arith.cmpi slt, %30, %31 : vector<8x384xi32>
    %cst_16 = arith.constant 0.000000e+00 : f32
    %33 = vector.broadcast %cst_16 : f32 to vector<8x128xf32>
    %c0_i32_17 = arith.constant 0 : i32
    %c2_i32 = arith.constant 2 : i32
    %34 = arith.subi %c2_i32, %c0_i32_17 : i32
    %35 = arith.index_cast %c0_i32_17 : i32 to index
    %c0_18 = arith.constant 0 : index
    %c0_19 = arith.constant 0 : index
    %36 = vector.load %arg7[%35, %c0_18, %c0_19] : memref<3x8x384xf32, #tpu.memory_space<vmem>>, vector<1x8x384xf32>
    %37 = vector.shape_cast %36 : vector<1x8x384xf32> to vector<8x384xf32>
    %38 = arith.index_cast %34 : i32 to index
    %c0_20 = arith.constant 0 : index
    %c0_21 = arith.constant 0 : index
    %39 = vector.load %arg7[%38, %c0_20, %c0_21] : memref<3x8x384xf32, #tpu.memory_space<vmem>>, vector<1x8x384xf32>
    %40 = vector.shape_cast %39 : vector<1x8x384xf32> to vector<8x384xf32>
    %41 = arith.select %32, %37, %40 : vector<8x384xi1>, vector<8x384xf32>
    %cst_22 = arith.constant dense<0.000000e+00> : vector<8x384xf32>
    %42 = tpu.matmul %33, %10, %cst_22 {dimension_numbers = #tpu.dot_dimension_numbers<[1], [0], [0], [1], [0, 0, 1, 1], [], []>} : vector<8x128xf32>, vector<128x384xf32>, vector<8x384xf32> -> vector<8x384xf32>
    %43 = vector.extract_strided_slice %41 {offsets = [0, 0], sizes = [8, 128], strides = [1, 1]} : vector<8x384xf32> to vector<8x128xf32>
    %44 = vector.extract_strided_slice %42 {offsets = [0, 0], sizes = [8, 128], strides = [1, 1]} : vector<8x384xf32> to vector<8x128xf32>
    %45 = arith.addf %43, %44 : vector<8x128xf32>
    %46 = arith.negf %45 : vector<8x128xf32>
    %47 = math.exp %46 : vector<8x128xf32>
    %cst_23 = arith.constant 1.000000e+00 : f32
    %48 = vector.broadcast %cst_23 : f32 to vector<8x128xf32>
    %49 = arith.addf %48, %47 : vector<8x128xf32>
    %50 = arith.divf %48, %49 : vector<8x128xf32>
    %51 = vector.extract_strided_slice %41 {offsets = [0, 128], sizes = [8, 128], strides = [1, 1]} : vector<8x384xf32> to vector<8x128xf32>
    %52 = vector.extract_strided_slice %42 {offsets = [0, 128], sizes = [8, 128], strides = [1, 1]} : vector<8x384xf32> to vector<8x128xf32>
    %53 = arith.addf %51, %52 : vector<8x128xf32>
    %54 = arith.negf %53 : vector<8x128xf32>
    %55 = math.exp %54 : vector<8x128xf32>
    %cst_24 = arith.constant 1.000000e+00 : f32
    %56 = vector.broadcast %cst_24 : f32 to vector<8x128xf32>
    %57 = arith.addf %56, %55 : vector<8x128xf32>
    %58 = arith.divf %56, %57 : vector<8x128xf32>
    %59 = vector.extract_strided_slice %41 {offsets = [0, 256], sizes = [8, 128], strides = [1, 1]} : vector<8x384xf32> to vector<8x128xf32>
    %60 = vector.extract_strided_slice %42 {offsets = [0, 256], sizes = [8, 128], strides = [1, 1]} : vector<8x384xf32> to vector<8x128xf32>
    %61 = arith.addf %60, %13 : vector<8x128xf32>
    %62 = arith.mulf %50, %61 : vector<8x128xf32>
    %63 = arith.addf %59, %62 : vector<8x128xf32>
    %64 = math.tanh %63 : vector<8x128xf32>
    %65 = arith.subf %33, %64 : vector<8x128xf32>
    %66 = arith.mulf %58, %65 : vector<8x128xf32>
    %67 = arith.addf %64, %66 : vector<8x128xf32>
    %68 = vector.extract_strided_slice %67 {offsets = [0, 0], sizes = [8, 64], strides = [1, 1]} : vector<8x128xf32> to vector<8x64xf32>
    %69 = arith.truncf %68 : vector<8x64xf32> to vector<8x64xbf16>
    %70 = arith.index_cast %c0_i32_17 : i32 to index
    %c0_25 = arith.constant 0 : index
    %c0_26 = arith.constant 0 : index
    %71 = vector.load %arg6[%70, %c0_25, %c0_26] : memref<3x8x128xbf16, #tpu.memory_space<vmem>>, vector<1x8x64xbf16>
    %72 = vector.shape_cast %71 : vector<1x8x64xbf16> to vector<8x64xbf16>
    %73 = vector.shape_cast %69 : vector<8x64xbf16> to vector<1x8x64xbf16>
    tpu.vector_store %arg6[%70, %c0_25, %c0_26], %73 {strides = array<i32>} : memref<3x8x128xbf16, #tpu.memory_space<vmem>>, vector<1x8x64xbf16>,
    %74 = vector.extract_strided_slice %67 {offsets = [0, 64], sizes = [8, 64], strides = [1, 1]} : vector<8x128xf32> to vector<8x64xf32>
    %75 = arith.truncf %74 : vector<8x64xf32> to vector<8x64xbf16>
    %76 = arith.index_cast %34 : i32 to index
    %c0_27 = arith.constant 0 : index
    %c64 = arith.constant 64 : index
    %77 = vector.load %arg6[%76, %c0_27, %c64] : memref<3x8x128xbf16, #tpu.memory_space<vmem>>, vector<1x8x64xbf16>
    %78 = vector.shape_cast %77 : vector<1x8x64xbf16> to vector<8x64xbf16>
    %79 = vector.shape_cast %75 : vector<8x64xbf16> to vector<1x8x64xbf16>
    tpu.vector_store %arg6[%76, %c0_27, %c64], %79 {strides = array<i32>} : memref<3x8x128xbf16, #tpu.memory_space<vmem>>, vector<1x8x64xbf16>,
    %c1_i32_28 = arith.constant 1 : i32
    %c2_i32_29 = arith.constant 2 : i32
    %80 = arith.subi %c2_i32_29, %c1_i32_28 : i32
    %81 = arith.index_cast %c1_i32_28 : i32 to index
    %c0_30 = arith.constant 0 : index
    %c0_31 = arith.constant 0 : index
    %82 = vector.load %arg7[%81, %c0_30, %c0_31] : memref<3x8x384xf32, #tpu.memory_space<vmem>>, vector<1x8x384xf32>
    %83 = vector.shape_cast %82 : vector<1x8x384xf32> to vector<8x384xf32>
    %84 = arith.index_cast %80 : i32 to index
    %c0_32 = arith.constant 0 : index
    %c0_33 = arith.constant 0 : index
    %85 = vector.load %arg7[%84, %c0_32, %c0_33] : memref<3x8x384xf32, #tpu.memory_space<vmem>>, vector<1x8x384xf32>
    %86 = vector.shape_cast %85 : vector<1x8x384xf32> to vector<8x384xf32>
    %87 = arith.select %32, %83, %86 : vector<8x384xi1>, vector<8x384xf32>
    %cst_34 = arith.constant dense<0.000000e+00> : vector<8x384xf32>
    %88 = tpu.matmul %67, %10, %cst_34 {dimension_numbers = #tpu.dot_dimension_numbers<[1], [0], [0], [1], [0, 0, 1, 1], [], []>} : vector<8x128xf32>, vector<128x384xf32>, vector<8x384xf32> -> vector<8x384xf32>
    %89 = vector.extract_strided_slice %87 {offsets = [0, 0], sizes = [8, 128], strides = [1, 1]} : vector<8x384xf32> to vector<8x128xf32>
    %90 = vector.extract_strided_slice %88 {offsets = [0, 0], sizes = [8, 128], strides = [1, 1]} : vector<8x384xf32> to vector<8x128xf32>
    %91 = arith.addf %89, %90 : vector<8x128xf32>
    %92 = arith.negf %91 : vector<8x128xf32>
    %93 = math.exp %92 : vector<8x128xf32>
    %cst_35 = arith.constant 1.000000e+00 : f32
    %94 = vector.broadcast %cst_35 : f32 to vector<8x128xf32>
    %95 = arith.addf %94, %93 : vector<8x128xf32>
    %96 = arith.divf %94, %95 : vector<8x128xf32>
    %97 = vector.extract_strided_slice %87 {offsets = [0, 128], sizes = [8, 128], strides = [1, 1]} : vector<8x384xf32> to vector<8x128xf32>
    %98 = vector.extract_strided_slice %88 {offsets = [0, 128], sizes = [8, 128], strides = [1, 1]} : vector<8x384xf32> to vector<8x128xf32>
    %99 = arith.addf %97, %98 : vector<8x128xf32>
    %100 = arith.negf %99 : vector<8x128xf32>
    %101 = math.exp %100 : vector<8x128xf32>
    %cst_36 = arith.constant 1.000000e+00 : f32
    %102 = vector.broadcast %cst_36 : f32 to vector<8x128xf32>
    %103 = arith.addf %102, %101 : vector<8x128xf32>
    %104 = arith.divf %102, %103 : vector<8x128xf32>
    %105 = vector.extract_strided_slice %87 {offsets = [0, 256], sizes = [8, 128], strides = [1, 1]} : vector<8x384xf32> to vector<8x128xf32>
    %106 = vector.extract_strided_slice %88 {offsets = [0, 256], sizes = [8, 128], strides = [1, 1]} : vector<8x384xf32> to vector<8x128xf32>
    %107 = arith.addf %106, %13 : vector<8x128xf32>
    %108 = arith.mulf %96, %107 : vector<8x128xf32>
    %109 = arith.addf %105, %108 : vector<8x128xf32>
    %110 = math.tanh %109 : vector<8x128xf32>
    %111 = arith.subf %67, %110 : vector<8x128xf32>
    %112 = arith.mulf %104, %111 : vector<8x128xf32>
    %113 = arith.addf %110, %112 : vector<8x128xf32>
    %114 = vector.extract_strided_slice %113 {offsets = [0, 0], sizes = [8, 64], strides = [1, 1]} : vector<8x128xf32> to vector<8x64xf32>
    %115 = arith.truncf %114 : vector<8x64xf32> to vector<8x64xbf16>
    %116 = arith.index_cast %c1_i32_28 : i32 to index
    %c0_37 = arith.constant 0 : index
    %c0_38 = arith.constant 0 : index
    %117 = vector.load %arg6[%116, %c0_37, %c0_38] : memref<3x8x128xbf16, #tpu.memory_space<vmem>>, vector<1x8x64xbf16>
    %118 = vector.shape_cast %117 : vector<1x8x64xbf16> to vector<8x64xbf16>
    %119 = vector.shape_cast %115 : vector<8x64xbf16> to vector<1x8x64xbf16>
    tpu.vector_store %arg6[%116, %c0_37, %c0_38], %119 {strides = array<i32>} : memref<3x8x128xbf16, #tpu.memory_space<vmem>>, vector<1x8x64xbf16>,
    %120 = vector.extract_strided_slice %113 {offsets = [0, 64], sizes = [8, 64], strides = [1, 1]} : vector<8x128xf32> to vector<8x64xf32>
    %121 = arith.truncf %120 : vector<8x64xf32> to vector<8x64xbf16>
    %122 = arith.index_cast %80 : i32 to index
    %c0_39 = arith.constant 0 : index
    %c64_40 = arith.constant 64 : index
    %123 = vector.load %arg6[%122, %c0_39, %c64_40] : memref<3x8x128xbf16, #tpu.memory_space<vmem>>, vector<1x8x64xbf16>
    %124 = vector.shape_cast %123 : vector<1x8x64xbf16> to vector<8x64xbf16>
    %125 = vector.shape_cast %121 : vector<8x64xbf16> to vector<1x8x64xbf16>
    tpu.vector_store %arg6[%122, %c0_39, %c64_40], %125 {strides = array<i32>} : memref<3x8x128xbf16, #tpu.memory_space<vmem>>, vector<1x8x64xbf16>,
    %c2_i32_41 = arith.constant 2 : i32
    %c2_i32_42 = arith.constant 2 : i32
    %126 = arith.subi %c2_i32_42, %c2_i32_41 : i32
    %127 = arith.index_cast %c2_i32_41 : i32 to index
    %c0_43 = arith.constant 0 : index
    %c0_44 = arith.constant 0 : index
    %128 = vector.load %arg7[%127, %c0_43, %c0_44] : memref<3x8x384xf32, #tpu.memory_space<vmem>>, vector<1x8x384xf32>
    %129 = vector.shape_cast %128 : vector<1x8x384xf32> to vector<8x384xf32>
    %130 = arith.index_cast %126 : i32 to index
    %c0_45 = arith.constant 0 : index
    %c0_46 = arith.constant 0 : index
    %131 = vector.load %arg7[%130, %c0_45, %c0_46] : memref<3x8x384xf32, #tpu.memory_space<vmem>>, vector<1x8x384xf32>
    %132 = vector.shape_cast %131 : vector<1x8x384xf32> to vector<8x384xf32>
    %133 = arith.select %32, %129, %132 : vector<8x384xi1>, vector<8x384xf32>
    %cst_47 = arith.constant dense<0.000000e+00> : vector<8x384xf32>
    %134 = tpu.matmul %113, %10, %cst_47 {dimension_numbers = #tpu.dot_dimension_numbers<[1], [0], [0], [1], [0, 0, 1, 1], [], []>} : vector<8x128xf32>, vector<128x384xf32>, vector<8x384xf32> -> vector<8x384xf32>
    %135 = vector.extract_strided_slice %133 {offsets = [0, 0], sizes = [8, 128], strides = [1, 1]} : vector<8x384xf32> to vector<8x128xf32>
    %136 = vector.extract_strided_slice %134 {offsets = [0, 0], sizes = [8, 128], strides = [1, 1]} : vector<8x384xf32> to vector<8x128xf32>
    %137 = arith.addf %135, %136 : vector<8x128xf32>
    %138 = arith.negf %137 : vector<8x128xf32>
    %139 = math.exp %138 : vector<8x128xf32>
    %cst_48 = arith.constant 1.000000e+00 : f32
    %140 = vector.broadcast %cst_48 : f32 to vector<8x128xf32>
    %141 = arith.addf %140, %139 : vector<8x128xf32>
    %142 = arith.divf %140, %141 : vector<8x128xf32>
    %143 = vector.extract_strided_slice %133 {offsets = [0, 128], sizes = [8, 128], strides = [1, 1]} : vector<8x384xf32> to vector<8x128xf32>
    %144 = vector.extract_strided_slice %134 {offsets = [0, 128], sizes = [8, 128], strides = [1, 1]} : vector<8x384xf32> to vector<8x128xf32>
    %145 = arith.addf %143, %144 : vector<8x128xf32>
    %146 = arith.negf %145 : vector<8x128xf32>
    %147 = math.exp %146 : vector<8x128xf32>
    %cst_49 = arith.constant 1.000000e+00 : f32
    %148 = vector.broadcast %cst_49 : f32 to vector<8x128xf32>
    %149 = arith.addf %148, %147 : vector<8x128xf32>
    %150 = arith.divf %148, %149 : vector<8x128xf32>
    %151 = vector.extract_strided_slice %133 {offsets = [0, 256], sizes = [8, 128], strides = [1, 1]} : vector<8x384xf32> to vector<8x128xf32>
    %152 = vector.extract_strided_slice %134 {offsets = [0, 256], sizes = [8, 128], strides = [1, 1]} : vector<8x384xf32> to vector<8x128xf32>
    %153 = arith.addf %152, %13 : vector<8x128xf32>
    %154 = arith.mulf %142, %153 : vector<8x128xf32>
    %155 = arith.addf %151, %154 : vector<8x128xf32>
    %156 = math.tanh %155 : vector<8x128xf32>
    %157 = arith.subf %113, %156 : vector<8x128xf32>
    %158 = arith.mulf %150, %157 : vector<8x128xf32>
    %159 = arith.addf %156, %158 : vector<8x128xf32>
    %160 = vector.extract_strided_slice %159 {offsets = [0, 0], sizes = [8, 64], strides = [1, 1]} : vector<8x128xf32> to vector<8x64xf32>
    %161 = arith.truncf %160 : vector<8x64xf32> to vector<8x64xbf16>
    %162 = arith.index_cast %c2_i32_41 : i32 to index
    %c0_50 = arith.constant 0 : index
    %c0_51 = arith.constant 0 : index
    %163 = vector.load %arg6[%162, %c0_50, %c0_51] : memref<3x8x128xbf16, #tpu.memory_space<vmem>>, vector<1x8x64xbf16>
    %164 = vector.shape_cast %163 : vector<1x8x64xbf16> to vector<8x64xbf16>
    %165 = vector.shape_cast %161 : vector<8x64xbf16> to vector<1x8x64xbf16>
    tpu.vector_store %arg6[%162, %c0_50, %c0_51], %165 {strides = array<i32>} : memref<3x8x128xbf16, #tpu.memory_space<vmem>>, vector<1x8x64xbf16>,
    %166 = vector.extract_strided_slice %159 {offsets = [0, 64], sizes = [8, 64], strides = [1, 1]} : vector<8x128xf32> to vector<8x64xf32>
    %167 = arith.truncf %166 : vector<8x64xf32> to vector<8x64xbf16>
    %168 = arith.index_cast %126 : i32 to index
    %c0_52 = arith.constant 0 : index
    %c64_53 = arith.constant 64 : index
    %169 = vector.load %arg6[%168, %c0_52, %c64_53] : memref<3x8x128xbf16, #tpu.memory_space<vmem>>, vector<1x8x64xbf16>
    %170 = vector.shape_cast %169 : vector<1x8x64xbf16> to vector<8x64xbf16>
    %171 = vector.shape_cast %167 : vector<8x64xbf16> to vector<1x8x64xbf16>
    tpu.vector_store %arg6[%168, %c0_52, %c64_53], %171 {strides = array<i32>} : memref<3x8x128xbf16, #tpu.memory_space<vmem>>, vector<1x8x64xbf16>,
    %c3_i32 = arith.constant 3 : i32
    return
  }
  func.func @transform_0(%arg0: i32) -> (i32, i32, i32) {
    %c0_i32 = arith.constant 0 : i32
    %c0_i32_0 = arith.constant 0 : i32
    %c0_i32_1 = arith.constant 0 : i32
    return %c0_i32, %arg0, %c0_i32_0 : i32, i32, i32
  }
  func.func @transform_1(%arg0: i32) -> (i32, i32) {
    %c0_i32 = arith.constant 0 : i32
    %c0_i32_0 = arith.constant 0 : i32
    %c0_i32_1 = arith.constant 0 : i32
    return %c0_i32, %c0_i32_0 : i32, i32
  }
  func.func @transform_2(%arg0: i32) -> (i32, i32) {
    %c0_i32 = arith.constant 0 : i32
    %c0_i32_0 = arith.constant 0 : i32
    %c0_i32_1 = arith.constant 0 : i32
    return %c0_i32, %c0_i32_0 : i32, i32
  }
  func.func @transform_3(%arg0: i32) -> (i32, i32) {
    %c0_i32 = arith.constant 0 : i32
    %c0_i32_0 = arith.constant 0 : i32
    %c0_i32_1 = arith.constant 0 : i32
    return %c0_i32, %c0_i32_0 : i32, i32
  }
  func.func @transform_4(%arg0: i32) -> (i32, i32) {
    %c0_i32 = arith.constant 0 : i32
    %c0_i32_0 = arith.constant 0 : i32
    %c0_i32_1 = arith.constant 0 : i32
    return %c0_i32, %c0_i32_0 : i32, i32
  }
  func.func @transform_5(%arg0: i32) -> (i32, i32, i32) {
    %c0_i32 = arith.constant 0 : i32
    %c0_i32_0 = arith.constant 0 : i32
    %c0_i32_1 = arith.constant 0 : i32
    return %c0_i32, %arg0, %c0_i32_0 : i32, i32, i32
  }
}

</mosaic_0001>

<bundles_post_ra>
// kernel: tpu_custom_call.1
= control target key start
LH: loop header
LB: loop body
LE: loop exit
PB: predicated region body
PF: predicated region fallthrough
CT: control target
= control target key end

     0   :  { %10 = vsyncpa [#allocation4], 0  ;;  %s1255_s0 = inlined_call_operand.hbm [shape: bf16[3,8,128], index: 0, kind: input, shape index: {}]   ;;  %s1256_s1 = inlined_call_operand.hbm [shape: f32[128,384], index: 1, kind: input, shape index: {}]   ;;  %s1257_s2 = inlined_call_operand.hbm [shape: f32[1,384], index: 2, kind: input, shape index: {}]   ;;  %s1258_s3 = inlined_call_operand.hbm [shape: f32[128,384], index: 3, kind: input, shape index: {}]   ;;  %s1259_s4 = inlined_call_operand.vmem [shape: f32[1,128], index: 4, kind: input, shape index: {}]   ;;  %s1260_s5 = inlined_call_operand.hbm [shape: bf16[3,8,128], index: 5, kind: output, shape index: {}]  }
   0x1   :  { %11 = vsyncpa [#allocation7], 0 }
   0x2   :  { %12 = vsyncpa [#allocation10], 0  ;;  %s31_s20 = sshll.u32 %s1256_s1, 4  ;;  %s32_s20 = int_to_ptr.hbm [resolvable:$true] %s31_s20 }
   0x3   :  { %13 = vsyncpa [#allocation5], 0  ;;  %s883_s21 = smov [#allocation6]   ;;  %s18_s25 = sshll.u32 %s1255_s0, 4  ;;  %s19_s25 = int_to_ptr.hbm [resolvable:$true] %s18_s25 }
   0x4   :  { %s33_s22 = sshll.u32 %s883_s21, 4  ;;  %s884_s26 = smov 384   ;;  %s34_s22 = int_to_ptr.vmem [resolvable:$true] %s33_s22 }
   0x5   :  { %s885_s27 = smov 24   ;;  %s886_s28 = smov [#allocation3]  }
   0x6   :  { %39 = dma.hbm_to_vmem [thread:$0]  %s32_s20, 6144, %s34_s22, [#allocation7], %s884_s26, %s884_s26, %s885_s27  }
   0x7   :  { %s20_s29 = sshll.u32 %s886_s28, 4  ;;  %s887_s30 = smov 64   ;;  %s21_s29 = int_to_ptr.vmem [resolvable:$true] %s20_s29 }
   0x8   :  { %s888_s6 = smov 4   ;;  %s45_s8 = sshll.u32 %s1257_s2, 4  ;;  %s46_s8 = int_to_ptr.hbm [resolvable:$true] %s45_s8 }
   0x9   :  { %26 = dma.hbm_to_vmem [thread:$0]  %s19_s25, 192, %s21_s29, [#allocation4], %s887_s30, %s887_s30, %s888_s6  }
   0xa   :  { %s889_s9 = smov [#allocation8]   ;;  %s55_s12 = sshll.u32 %s1258_s3, 4  ;;  %s56_s12 = int_to_ptr.hbm [resolvable:$true] %s55_s12 }
   0xb   :  { %s47_s0 = sshll.u32 %s889_s9, 4  ;;  %s890_s13 = smov [#allocation9]   ;;  %s48_s0 = int_to_ptr.vmem [resolvable:$true] %s47_s0 }
   0xc   :  { %50 = dma.hbm_to_vmem [thread:$0]  %s46_s8, 48, %s48_s0, [#allocation7]  }
   0xd   :  { %s57_s14 = sshll.u32 %s890_s13, 4  ;;  %s58_s14 = int_to_ptr.vmem [resolvable:$true] %s57_s14 }
   0xe   :  { %63 = dma.hbm_to_vmem [thread:$0]  %s56_s12, 6144, %s58_s14, [#allocation10], %s884_s26, %s884_s26, %s885_s27  }
   0xf   :  { %875 = dma.done.wait [#allocation4], 192  }
  0x10   :  { %876 = vsyncadd [#allocation4], 4294967104 }
  0x11   :  { %877 = dma.done.wait [#allocation7], 6192  }
  0x12   :  { %878 = vsyncadd [#allocation7], 4294961104 }
  0x13   :  { %879 = dma.done.wait [#allocation10], 6144  }
  0x14   :  { %880 = vsyncadd [#allocation10], 4294961152  ;;  %v133_v0 = vld [vmem:[#allocation6 + $0x168] sm:$0xff]  ;;  %v134_v1 = vld [vmem:[#allocation6 + $0x170] sm:$0xff]  ;;  %vm444_vm11 = vcmask 519168   ;;  %vm447_vm12 = vcmask 1043968  }
  0x15   :  { %v130_v2 = vld [vmem:[#allocation6 + $0x150] sm:$0xff]  ;;  %144 = vmatpush.msra.mxu0 %v133_v0  ;;  %170 = vmatpush.msra.mxu1 %v134_v1  ;;  %v131_v3 = vld [vmem:[#allocation6 + $0x158] sm:$0xff]  ;;  %v128_v5 = vld [vmem:[#allocation6 + $0x140] sm:$0xff]  ;;  %s689_s18 = sshll.u32 %s1260_s5, 4  ;;  %s690_s18 = int_to_ptr.hbm [resolvable:$true] %s689_s18 }
  0x16   :  { %v127_v4 = vld [vmem:[#allocation6 + $0x138] sm:$0xff]  ;;  %v124_v6 = vld [vmem:[#allocation6 + $0x120] sm:$0xff]  ;;  %v125_v7 = vld [vmem:[#allocation6 + $0x128] sm:$0xff] }
  0x17   :  { %145 = vmatpush.msra.mxu0 %v130_v2  ;;  %171 = vmatpush.msra.mxu1 %v131_v3  ;;  %v135_v8 = vld [vmem:[#allocation6 + $0x178] sm:$0xff]  ;;  %v132_v9 = vld [vmem:[#allocation6 + $0x160] sm:$0xff]  ;;  %v938_v10 = vld [vmem:[#allocation9 + $0x168] sm:$0xff] }
  0x18   :  { %v121_v11 = vld [vmem:[#allocation6 + $0x108] sm:$0xff]  ;;  %v122_v12 = vld [vmem:[#allocation6 + $0x110] sm:$0xff]  ;;  %196 = vmatpush.msra.mxu2 %v135_v8  ;;  %336 = vmatpush.msra.mxu3 %v938_v10  ;;  %v119_v16 = vld [vmem:[#allocation6 + $0xf8] sm:$0xff] }
  0x19   :  { %146 = vmatpush.msra.mxu0 %v127_v4  ;;  %172 = vmatpush.msra.mxu1 %v128_v5  ;;  %v941_v13 = vld [vmem:[#allocation9 + $0x150] sm:$0xff]  ;;  %v129_v14 = vld [vmem:[#allocation6 + $0x148] sm:$0xff]  ;;  %v944_v17 = vld [vmem:[#allocation9 + $0x138] sm:$0xff] }
  0x1a   :  { %v118_v15 = vld [vmem:[#allocation6 + $0xf0] sm:$0xff]  ;;  %197 = vmatpush.msra.mxu2 %v132_v9  ;;  %337 = vmatpush.msra.mxu3 %v941_v13  ;;  %v946_v19 = vld [vmem:[#allocation9 + $0x120] sm:$0xff]  ;;  %v115_v20 = vld [vmem:[#allocation6 + $0xd8] sm:$0xff] }
  0x1b   :  { %147 = vmatpush.msra.mxu0 %v124_v6  ;;  %173 = vmatpush.msra.mxu1 %v125_v7  ;;  %v126_v18 = vld [vmem:[#allocation6 + $0x130] sm:$0xff]  ;;  %v116_v21 = vld [vmem:[#allocation6 + $0xe0] sm:$0xff]  ;;  %v123_v22 = vld [vmem:[#allocation6 + $0x118] sm:$0xff] }
  0x1c   :  { %198 = vmatpush.msra.mxu2 %v129_v14  ;;  %338 = vmatpush.msra.mxu3 %v944_v17  ;;  %v949_v23 = vld [vmem:[#allocation9 + $0x108] sm:$0xff]  ;;  %v112_v24 = vld [vmem:[#allocation6 + $0xc0] sm:$0xff]  ;;  %v952_v27 = vld [vmem:[#allocation9 + $0xf0] sm:$0xff] }
  0x1d   :  { %148 = vmatpush.msra.mxu0 %v121_v11  ;;  %174 = vmatpush.msra.mxu1 %v122_v12  ;;  %v113_v25 = vld [vmem:[#allocation6 + $0xc8] sm:$0xff]  ;;  %v120_v26 = vld [vmem:[#allocation6 + $0x100] sm:$0xff]  ;;  %v110_v29 = vld [vmem:[#allocation6 + $0xb0] sm:$0xff]  ;;  %v891_v12 = vmov 0.0  }
  0x1e   :  { %199 = vmatpush.msra.mxu2 %v126_v18  ;;  %339 = vmatpush.msra.mxu3 %v946_v19  ;;  %v109_v28 = vld [vmem:[#allocation6 + $0xa8] sm:$0xff]  ;;  %v955_v31 = vld [vmem:[#allocation9 + $0xd8] sm:$0xff]  ;;  %v106_v32 = vld [vmem:[#allocation6 + $0x90] sm:$0xff] }
  0x1f   :  { %149 = vmatpush.msra.mxu0 %v118_v15  ;;  %175 = vmatpush.msra.mxu1 %v119_v16  ;;  %v117_v30 = vld [vmem:[#allocation6 + $0xe8] sm:$0xff]  ;;  %v107_v33 = vld [vmem:[#allocation6 + $0x98] sm:$0xff]  ;;  %v114_v34 = vld [vmem:[#allocation6 + $0xd0] sm:$0xff] }
  0x20   :  { %200 = vmatpush.msra.mxu2 %v123_v22  ;;  %340 = vmatpush.msra.mxu3 %v949_v23  ;;  %v958_v35 = vld [vmem:[#allocation9 + $0xc0] sm:$0xff]  ;;  %v103_v36 = vld [vmem:[#allocation6 + $0x78] sm:$0xff]  ;;  %v961_v39 = vld [vmem:[#allocation9 + $0xa8] sm:$0xff] }
  0x21   :  { %150 = vmatpush.msra.mxu0 %v115_v20  ;;  %176 = vmatpush.msra.mxu1 %v116_v21  ;;  %v104_v37 = vld [vmem:[#allocation6 + $0x80] sm:$0xff]  ;;  %v111_v38 = vld [vmem:[#allocation6 + $0xb8] sm:$0xff]  ;;  %v101_v41 = vld [vmem:[#allocation6 + $0x68] sm:$0xff] }
  0x22   :  { %201 = vmatpush.msra.mxu2 %v120_v26  ;;  %341 = vmatpush.msra.mxu3 %v952_v27  ;;  %v100_v40 = vld [vmem:[#allocation6 + $0x60] sm:$0xff]  ;;  %v964_v43 = vld [vmem:[#allocation9 + $0x90] sm:$0xff]  ;;  %v97_v44 = vld [vmem:[#allocation6 + $0x48] sm:$0xff] }
  0x23   :  { %151 = vmatpush.msra.mxu0 %v112_v24  ;;  %177 = vmatpush.msra.mxu1 %v113_v25  ;;  %v108_v42 = vld [vmem:[#allocation6 + $0xa0] sm:$0xff]  ;;  %v98_v45 = vld [vmem:[#allocation6 + $0x50] sm:$0xff]  ;;  %v105_v46 = vld [vmem:[#allocation6 + $0x88] sm:$0xff] }
  0x24   :  { %202 = vmatpush.msra.mxu2 %v117_v30  ;;  %342 = vmatpush.msra.mxu3 %v955_v31  ;;  %v967_v47 = vld [vmem:[#allocation9 + $0x78] sm:$0xff]  ;;  %v94_v48 = vld [vmem:[#allocation6 + $0x30] sm:$0xff]  ;;  %v970_v52 = vld [vmem:[#allocation9 + $0x60] sm:$0xff] }
  0x25   :  { %152 = vmatpush.msra.mxu0 %v109_v28  ;;  %178 = vmatpush.msra.mxu1 %v110_v29  ;;  %v95_v49 = vld [vmem:[#allocation6 + $0x38] sm:$0xff]  ;;  %v102_v51 = vld [vmem:[#allocation6 + $0x70] sm:$0xff]  ;;  %v92_v54 = vld [vmem:[#allocation6 + $0x20] sm:$0xff] }
  0x26   :  { %203 = vmatpush.msra.mxu2 %v114_v34  ;;  %343 = vmatpush.msra.mxu3 %v958_v35  ;;  %v711_v50 = vld [vmem:[#allocation3] sm:$0xff]   ;;  %v973_v56 = vld [vmem:[#allocation9 + $0x48] sm:$0xff]  ;;  %v88_v57 = vld [vmem:[#allocation6] sm:$0xff] }
  0x27   :  { %153 = vmatpush.msra.mxu0 %v106_v32  ;;  %179 = vmatpush.msra.mxu1 %v107_v33  ;;  %v91_v53 = vld [vmem:[#allocation6 + $0x18] sm:$0xff]  ;;  %v89_v58 = vld [vmem:[#allocation6 + $0x8] sm:$0xff]  ;;  %v712_v59 = vunpack.c.l.bf16 %v711_v50  ;;  %v96_v61 = vld [vmem:[#allocation6 + $0x40] sm:$0xff]  ;;  %v713_v8 = vunpack.c.h.bf16 %v711_v50 }
  0x28   :  { %204 = vmatpush.msra.mxu2 %v111_v38  ;;  %344 = vmatpush.msra.mxu3 %v961_v39  ;;  %v99_v55 = vld [vmem:[#allocation6 + $0x58] sm:$0xff]  ;;  %v93_v1 = vld [vmem:[#allocation6 + $0x28] sm:$0xff]  ;;  %v90_v5 = vld [vmem:[#allocation6 + $0x10] sm:$0xff] }
  0x29   :  { %154 = vmatpush.msra.mxu0 %v103_v36  ;;  %180 = vmatpush.msra.mxu1 %v104_v37  ;;  %v976_v60 = vld [vmem:[#allocation9 + $0x170] sm:$0xff]  ;;  %v981_v63 = vld [vmem:[#allocation9 + $0x178] sm:$0xff]  ;;  %v988_v3 = vld [vmem:[#allocation9 + $0x160] sm:$0xff] }
  0x2a   :  { %205 = vmatpush.msra.mxu2 %v108_v42  ;;  %345 = vmatpush.msra.mxu3 %v964_v43  ;;  %v979_v62 = vld [vmem:[#allocation9 + $0x30] sm:$0xff]  ;;  %v983_v0 = vld [vmem:[#allocation9 + $0x158] sm:$0xff]  ;;  %v990_v4 = vld [vmem:[#allocation9 + $0x140] sm:$0xff] }
  0x2b   :  { %155 = vmatpush.msra.mxu0 %v100_v40  ;;  %181 = vmatpush.msra.mxu1 %v101_v41  ;;  %v986_v2 = vld [vmem:[#allocation9 + $0x18] sm:$0xff]  ;;  %v995_v6 = vld [vmem:[#allocation9] sm:$0xff]  ;;  %v997_v7 = vld [vmem:[#allocation9 + $0x128] sm:$0xff] }
  0x2c   :  { %206 = vmatpush.msra.mxu2 %v105_v46  ;;  %346 = vmatpush.msra.mxu3 %v967_v47  ;;  %v1002_v9 = vld [vmem:[#allocation9 + $0x110] sm:$0xff]  ;;  %v1005_v11 = vld [vmem:[#allocation9 + $0x148] sm:$0xff]  ;;  %v1009_v14 = vld [vmem:[#allocation9 + $0xf8] sm:$0xff] }
  0x2d   :  { %156 = vmatpush.msra.mxu0 %v97_v44  ;;  %182 = vmatpush.msra.mxu1 %v98_v45  ;;  %v1011_v15 = vld [vmem:[#allocation9 + $0x130] sm:$0xff]  ;;  %v84_v16 = vld [vmem:[#allocation3 + $0x8] sm:$0xf]  ;;  %v1015_v18 = vld [vmem:[#allocation9 + $0xe0] sm:$0xff] }
  0x2e   :  { %207 = vmatpush.msra.mxu2 %v102_v51  ;;  %347 = vmatpush.msra.mxu3 %v970_v52  ;;  %v1017_v20 = vld [vmem:[#allocation9 + $0x118] sm:$0xff]  ;;  %v1023_v21 = vld [vmem:[#allocation9 + $0xc8] sm:$0xff]  ;;  %v87_v22 = vunpack.c.l.bf16 %v84_v16  ;;  %v1025_v24 = vld [vmem:[#allocation9 + $0x100] sm:$0xff] }
  0x2f   :  { %157 = vmatpush.msra.mxu0 %v94_v48  ;;  %183 = vmatpush.msra.mxu1 %v95_v49  ;;  %v1031_v25 = vld [vmem:[#allocation9 + $0xb0] sm:$0xff]  ;;  %v1033_v26 = vld [vmem:[#allocation9 + $0xe8] sm:$0xff]  ;;  %v1038_v28 = vld [vmem:[#allocation9 + $0x98] sm:$0xff] }
  0x30   :  { %208 = vmatpush.msra.mxu2 %v99_v55  ;;  %348 = vmatpush.msra.mxu3 %v973_v56  ;;  %v1040_v29 = vld [vmem:[#allocation9 + $0xd0] sm:$0xff]  ;;  %v1044_v30 = vld [vmem:[#allocation9 + $0x80] sm:$0xff]  ;;  %v1046_v32 = vld [vmem:[#allocation9 + $0xb8] sm:$0xff] }
  0x31   :  { %158 = vmatpush.msra.mxu0 %v91_v53  ;;  %184 = vmatpush.msra.mxu1 %v92_v54  ;;  %v1052_v33 = vld [vmem:[#allocation9 + $0x68] sm:$0xff]  ;;  %v1054_v34 = vld [vmem:[#allocation9 + $0xa0] sm:$0xff]  ;;  %v1060_v36 = vld [vmem:[#allocation9 + $0x50] sm:$0xff] }
  0x32   :  { %209 = vmatpush.msra.mxu2 %v96_v61  ;;  %349 = vmatpush.msra.mxu3 %v979_v62  ;;  %v1062_v37 = vld [vmem:[#allocation9 + $0x88] sm:$0xff]  ;;  %v1067_v38 = vld [vmem:[#allocation9 + $0x38] sm:$0xff]  ;;  %v1069_v40 = vld [vmem:[#allocation9 + $0x70] sm:$0xff] }
  0x33   :  { %159 = vmatpush.msra.mxu0 %v88_v57  ;;  %185 = vmatpush.msra.mxu1 %v89_v58  ;;  %v1075_v41 = vld [vmem:[#allocation9 + $0x20] sm:$0xff]  ;;  %v1077_v42 = vld [vmem:[#allocation9 + $0x58] sm:$0xff]  ;;  %v1083_v44 = vld [vmem:[#allocation9 + $0x8] sm:$0xff] }
  0x34   :  { %160 = vmatmul.f32.vlgmr.msra.gmra.mxu0 %v712_v59  ;;  %186 = vmatmul.f32.vlgmr.msra.gmra.mxu1 %v712_v59  ;;  %v1085_v45 = vld [vmem:[#allocation9 + $0x40] sm:$0xff]  ;;  %v1091_v46 = vld [vmem:[#allocation9 + $0x28] sm:$0xff]  ;;  %v1098_v48 = vld [vmem:[#allocation9 + $0x10] sm:$0xff] }
  0x35   :  { %356 = vmatpush.msrb.mxu0 %v976_v60  ;;  %376 = vmatpush.msrb.mxu1 %v981_v63 }
  0x36   :  { %210 = vmatpush.msra.mxu2 %v93_v1  ;;  %350 = vmatpush.msra.mxu3 %v986_v2 }
  0x37   :  { %357 = vmatpush.msrb.mxu0 %v983_v0  ;;  %377 = vmatpush.msrb.mxu1 %v988_v3 }
  0x38   :  { %211 = vmatpush.msra.mxu2 %v90_v5  ;;  %351 = vmatpush.msra.mxu3 %v995_v6 }
  0x39   :  { %358 = vmatpush.msrb.mxu0 %v990_v4  ;;  %212 = vmatmul.f32.vlgmr.msra.gmra.mxu2 %v712_v59 }
  0x3a   :  { %352 = vmatmul.f32.vlgmr.msra.gmra.mxu3 %v891_v12  ;;  %378 = vmatpush.msrb.mxu1 %v1005_v11 }
  0x3b   :  { %359 = vmatpush.msrb.mxu0 %v997_v7  ;;  %453 = vmatpush.msrb.mxu2 %v938_v10 }
  0x3c   :  { %163 = vmatmul.f32.gmra.mxu0 %v713_v8  ;;  %189 = vmatmul.f32.gmra.mxu1 %v713_v8 }
  0x3d   :  { %360 = vmatpush.msrb.mxu0 %v1002_v9  ;;  %473 = vmatpush.msrb.mxu3 %v976_v60 }
  0x3e   :  { %379 = vmatpush.msrb.mxu1 %v1011_v15  ;;  %454 = vmatpush.msrb.mxu2 %v941_v13 }
  0x3f   :  { %361 = vmatpush.msrb.mxu0 %v1009_v14  ;;  %474 = vmatpush.msrb.mxu3 %v983_v0 }
  0x40   :  { %380 = vmatpush.msrb.mxu1 %v1017_v20  ;;  %455 = vmatpush.msrb.mxu2 %v944_v17 }
  0x41   :  { %362 = vmatpush.msrb.mxu0 %v1015_v18  ;;  %215 = vmatmul.f32.gmra.mxu2 %v713_v8 }
  0x42   :  { %475 = vmatpush.msrb.mxu3 %v990_v4  ;;  %381 = vmatpush.msrb.mxu1 %v1025_v24 }
  0x43   :  { %363 = vmatpush.msrb.mxu0 %v1023_v21  ;;  %456 = vmatpush.msrb.mxu2 %v946_v19 }
  0x44   :  { %166 = vmatmul.f32.gmra.mxu0 %v87_v22  ;;  %192 = vmatmul.f32.gmra.mxu1 %v87_v22 }
  0x45   :  { %364 = vmatpush.msrb.mxu0 %v1031_v25  ;;  %382 = vmatpush.msrb.mxu1 %v1033_v26 }
  0x46   :  { %476 = vmatpush.msrb.mxu3 %v997_v7  ;;  %457 = vmatpush.msrb.mxu2 %v949_v23 }
  0x47   :  { %365 = vmatpush.msrb.mxu0 %v1038_v28  ;;  %383 = vmatpush.msrb.mxu1 %v1040_v29 }
  0x48   :  { %477 = vmatpush.msrb.mxu3 %v1002_v9  ;;  %458 = vmatpush.msrb.mxu2 %v952_v27 }
  0x49   :  { %366 = vmatpush.msrb.mxu0 %v1044_v30  ;;  %384 = vmatpush.msrb.mxu1 %v1046_v32 }
  0x4a   :  { %218 = vmatmul.f32.gmra.mxu2 %v87_v22  ;;  %478 = vmatpush.msrb.mxu3 %v1009_v14 }
  0x4b   :  { %367 = vmatpush.msrb.mxu0 %v1052_v33  ;;  %385 = vmatpush.msrb.mxu1 %v1054_v34 }
  0x4c   :  { %479 = vmatpush.msrb.mxu3 %v1015_v18  ;;  %459 = vmatpush.msrb.mxu2 %v955_v31 }
  0x4d   :  { %368 = vmatpush.msrb.mxu0 %v1060_v36  ;;  %386 = vmatpush.msrb.mxu1 %v1062_v37 }
  0x4e   :  { %480 = vmatpush.msrb.mxu3 %v1023_v21  ;;  %460 = vmatpush.msrb.mxu2 %v958_v35 }
  0x4f   :  { %369 = vmatpush.msrb.mxu0 %v1067_v38  ;;  %387 = vmatpush.msrb.mxu1 %v1069_v40 }
  0x50   :  { %481 = vmatpush.msrb.mxu3 %v1031_v25  ;;  %461 = vmatpush.msrb.mxu2 %v961_v39 }
  0x51   :  { %370 = vmatpush.msrb.mxu0 %v1075_v41  ;;  %388 = vmatpush.msrb.mxu1 %v1077_v42 }
  0x52   :  { %482 = vmatpush.msrb.mxu3 %v1038_v28  ;;  %462 = vmatpush.msrb.mxu2 %v964_v43 }
  0x53   :  { %371 = vmatpush.msrb.mxu0 %v1083_v44  ;;  %389 = vmatpush.msrb.mxu1 %v1085_v45 }
  0x54   :  { %372 = vmatmul.f32.vlgmr.msrb.gmra.mxu0 %v891_v12  ;;  %483 = vmatpush.msrb.mxu3 %v1044_v30 }
  0x55   :  { %390 = vmatpush.msrb.mxu1 %v1091_v46  ;;  %493 = vmatpush.msra.mxu0 %v981_v63 }
  0x56   :  { %463 = vmatpush.msrb.mxu2 %v967_v47  ;;  %484 = vmatpush.msrb.mxu3 %v1052_v33 }
  0x57   :  { %391 = vmatpush.msrb.mxu1 %v1098_v48  ;;  %494 = vmatpush.msra.mxu0 %v988_v3 }
  0x58   :  { %392 = vmatmul.f32.vlgmr.msrb.gmra.mxu1 %v891_v12  ;;  %464 = vmatpush.msrb.mxu2 %v970_v52 }
  0x59   :  { %495 = vmatpush.msra.mxu0 %v1005_v11  ;;  %573 = vmatpush.msra.mxu1 %v938_v10 }
  0x5a   :  { %485 = vmatpush.msrb.mxu3 %v1060_v36  ;;  %465 = vmatpush.msrb.mxu2 %v973_v56 }
  0x5b   :  { %496 = vmatpush.msra.mxu0 %v1011_v15  ;;  %574 = vmatpush.msra.mxu1 %v941_v13 }
  0x5c   :  { %486 = vmatpush.msrb.mxu3 %v1067_v38  ;;  %466 = vmatpush.msrb.mxu2 %v979_v62 }
  0x5d   :  { %497 = vmatpush.msra.mxu0 %v1017_v20  ;;  %575 = vmatpush.msra.mxu1 %v944_v17  ;;  %v283_v17 = vlaneseq }
  0x5e   :  { %487 = vmatpush.msrb.mxu3 %v1075_v41  ;;  %467 = vmatpush.msrb.mxu2 %v986_v2 }
  0x5f   :  { %498 = vmatpush.msra.mxu0 %v1025_v24  ;;  %576 = vmatpush.msra.mxu1 %v946_v19  ;;  %v136_v19 = vld [vmem:[#allocation8] sm:$0x7] }
  0x60   :  { %488 = vmatpush.msrb.mxu3 %v1083_v44  ;;  %468 = vmatpush.msrb.mxu2 %v995_v6 }
  0x61   :  { %499 = vmatpush.msra.mxu0 %v1033_v26  ;;  %577 = vmatpush.msra.mxu1 %v949_v23  ;;  %v284_v23 = vand.u32 127, %v283_v17 }
  0x62   :  { %613 = vmatpush.msra.mxu3 %v981_v63  ;;  %593 = vmatpush.msra.mxu2 %v976_v60  ;;  %v140_v60 = vperm.slane %v136_v19, 2 }
  0x63   :  { %500 = vmatpush.msra.mxu0 %v1040_v29  ;;  %578 = vmatpush.msra.mxu1 %v952_v27  ;;  %v138_v27 = vperm.slane %v136_v19, 0  ;;  %vm323_vm0 = vcmp.lt.s32.totalorder %v284_v23, 64 }
  0x64   :  { %614 = vmatpush.msra.mxu3 %v988_v3  ;;  %594 = vmatpush.msra.mxu2 %v983_v0 }
  0x65   :  { %501 = vmatpush.msra.mxu0 %v1046_v32  ;;  %579 = vmatpush.msra.mxu1 %v955_v31  ;;  %v139_v31 = vperm.slane %v136_v19, 1 }
  0x66   :  { %615 = vmatpush.msra.mxu3 %v1005_v11  ;;  %595 = vmatpush.msra.mxu2 %v990_v4 }
  0x67   :  { %502 = vmatpush.msra.mxu0 %v1054_v34  ;;  %580 = vmatpush.msra.mxu1 %v958_v35 }
  0x68   :  { %616 = vmatpush.msra.mxu3 %v1011_v15  ;;  %596 = vmatpush.msra.mxu2 %v997_v7 }
  0x69   :  { %503 = vmatpush.msra.mxu0 %v1062_v37  ;;  %581 = vmatpush.msra.mxu1 %v961_v39 }
  0x6a   :  { %617 = vmatpush.msra.mxu3 %v1017_v20  ;;  %597 = vmatpush.msra.mxu2 %v1002_v9 }
  0x6b   :  { %504 = vmatpush.msra.mxu0 %v1069_v40  ;;  %582 = vmatpush.msra.mxu1 %v964_v43  ;;  %v285_v43 = vadd.s32 128, %v284_v23 }
  0x6c   :  { %618 = vmatpush.msra.mxu3 %v1025_v24  ;;  %598 = vmatpush.msra.mxu2 %v1009_v14 }
  0x6d   :  { %505 = vmatpush.msra.mxu0 %v1077_v42  ;;  %583 = vmatpush.msra.mxu1 %v967_v47  ;;  %v298_v51 = vand.u32 127, %v285_v43 }
  0x6e   :  { %619 = vmatpush.msra.mxu3 %v1033_v26  ;;  %599 = vmatpush.msra.mxu2 %v1015_v18  ;;  %v1220_v26 = vld [vmem:[%s1259_s4] ss:$0 sm:$0xff]  ;;  %s892_s4 = smov [#allocation11]  }
  0x6f   :  { %506 = vmatpush.msra.mxu0 %v1085_v45  ;;  %584 = vmatpush.msra.mxu1 %v970_v52  ;;  %vm1185_vm1 = vcmp.lt.s32.totalorder %v298_v51, 64  ;;  %s687_s15 = sshll.u32 %s892_s4, 4  ;;  %s688_s15 = int_to_ptr.vmem [resolvable:$true] %s687_s15 }
  0x70   :  { %620 = vmatpush.msra.mxu3 %v1040_v29  ;;  %600 = vmatpush.msra.mxu2 %v1023_v21 }
  0x71   :  { %507 = vmatpush.msra.mxu0 %v1091_v46  ;;  %585 = vmatpush.msra.mxu1 %v973_v56 }
  0x72   :  { %621 = vmatpush.msra.mxu3 %v1046_v32  ;;  %601 = vmatpush.msra.mxu2 %v1031_v25 }
  0x73   :  { %508 = vmatpush.msra.mxu0 %v1098_v48  ;;  %586 = vmatpush.msra.mxu1 %v979_v62 }
  0x74   :  { %622 = vmatpush.msra.mxu3 %v1054_v34  ;;  %602 = vmatpush.msra.mxu2 %v1038_v28 }
  0x75   :  { %587 = vmatpush.msra.mxu1 %v986_v2  ;;  %v286_v2 = vadd.s32 256, %v284_v23 }
  0x76   :  { %623 = vmatpush.msra.mxu3 %v1062_v37  ;;  %603 = vmatpush.msra.mxu2 %v1044_v30 }
  0x77   :  { %588 = vmatpush.msra.mxu1 %v995_v6  ;;  %v305_v5 = vand.u32 127, %v286_v2 }
  0x78   :  { %624 = vmatpush.msra.mxu3 %v1069_v40  ;;  %604 = vmatpush.msra.mxu2 %v1052_v33 }
  0x79   :  { %vm1203_vm2 = vcmp.lt.s32.totalorder %v305_v5, 64 }
  0x7a   :  { %625 = vmatpush.msra.mxu3 %v1077_v42  ;;  %605 = vmatpush.msra.mxu2 %v1060_v36 }
  0x7c   :  { %626 = vmatpush.msra.mxu3 %v1085_v45  ;;  %606 = vmatpush.msra.mxu2 %v1067_v38 }
  0x7e   :  { %627 = vmatpush.msra.mxu3 %v1091_v46  ;;  %607 = vmatpush.msra.mxu2 %v1075_v41 }
  0x80   :  { %628 = vmatpush.msra.mxu3 %v1098_v48  ;;  %608 = vmatpush.msra.mxu2 %v1083_v44 }
  0xb1   :  { %v161_v10 = vpop.f32.mrf.mxu0  ;;  %v187_v13 = vpop.f32.mrf.mxu1 }
  0xb2   :  { %v162_v55 = vadd.f32 %v161_v10, %v138_v27  ;;  %v1189_v56 = vadd.f32 %v187_v13, %v139_v31 }
  0xb9   :  { %v164_v35 = vpop.f32.mrf.mxu0  ;;  %v190_v39 = vpop.f32.mrf.mxu1 }
  0xba   :  { %v1181_v47 = vadd.f32 %v164_v35, %v138_v27  ;;  %v1183_v49 = vadd.f32 %v190_v39, %v139_v31 }
  0xbc   :  { %v213_v50 = vpop.f32.mrf.mxu2 }
  0xbd   :  { %v353_v59 = vpop.f32.mrf.mxu3  ;;  %v1201_v6 = vadd.f32 %v213_v50, %v140_v60 }
  0xc1   :  { %v167_v52 = vpop.f32.mrf.mxu0  ;;  %v193_v53 = vpop.f32.mrf.mxu1 }
  0xc2   :  { %v168_v57 = vadd.f32 %v167_v52, %v138_v27  ;;  %v1191_v58 = vadd.f32 %v193_v53, %v139_v31 }
  0xc4   :  { %v333_v61 = vsel %vm323_vm0, %v162_v55, %v168_v57  ;;  %v1193_v62 = vsel %vm323_vm0, %v168_v57, %v162_v55  ;;  %v571_v63 = vsel %vm1185_vm1, %v1191_v58, %v1189_v56  ;;  %v216_v1 = vpop.f32.mrf.mxu2  ;;  %v334_v15 = vsel %vm1185_vm1, %v1189_v56, %v1191_v58 }
  0xc5   :  { %v396_v0 = vadd.f32 %v353_v59, %v333_v61  ;;  %v1199_v3 = vadd.f32 %v216_v1, %v140_v60 }
  0xc7   :  { %v704_v4 = vmul.f32 -1.442695, %v396_v0 }
  0xc9   :  { %725 = vpow2.f32 %v704_v4 }
  0xcd   :  { %v219_v7 = vpop.f32.mrf.mxu2 }
  0xce   :  { %v1207_v9 = vadd.f32 %v219_v7, %v140_v60 }
  0xcf   :  { %v726_v11 = vpop.eup %725 }
  0xd0   :  { %v400_v12 = vadd.f32 1.0, %v726_v11  ;;  %v572_v14 = vsel %vm1203_vm2, %v1207_v9, %v1201_v6  ;;  %v335_v44 = vsel %vm1203_vm2, %v1201_v6, %v1207_v9 }
  0xd1   :  { %v373_v16 = vpop.f32.mrf.mxu0 }
  0xd2   :  { %727 = vrcp.f32 %v400_v12  ;;  %v416_v18 = vadd.f32 %v373_v16, %v334_v15  ;;  %v412_v32 = vand.u32 2147483648, %v400_v12  ;;  %v410_v33 = vand.u32 2147483647, %v400_v12 }
  0xd3   :  { %vm406_vm4 = vweird.f32 %v400_v12 }
  0xd4   :  { %v705_v20 = vmul.f32 -1.442695, %v416_v18  ;;  %v413_v37 = vor.u32 1.1754944e-38, %v412_v32  ;;  %vm411_vm6 = vcmp.eq.f32.partialorder %v410_v33, 8.507059e+37 }
  0xd5   :  { %v393_v29 = vpop.f32.mrf.mxu1 }
  0xd6   :  { %729 = vpow2.f32 %v705_v20  ;;  %v436_v36 = vadd.f32 %v1220_v26, %v393_v29 }
  0xd8   :  { %v728_v21 = vpop.eup %727 }
  0xd9   :  { %v402_v22 = vmul.f32 %v728_v21, %v400_v12  ;;  %vm407_vm3 = vweird.f32 %v728_v21 }
  0xda   :  { %vm408_vm5 = vmor %vm406_vm4, %vm407_vm3 }
  0xdb   :  { %v403_v24 = vsub.f32 1.0, %v402_v22 }
  0xdc   :  { %v730_v25 = vpop.eup %729 }
  0xdd   :  { %v420_v28 = vadd.f32 1.0, %v730_v25  ;;  %v404_v30 = vmul.f32 %v728_v21, %v403_v24 }
  0xdf   :  { %731 = vrcp.f32 %v420_v28  ;;  %v405_v34 = vadd.f32 %v728_v21, %v404_v30  ;;  %v432_v10 = vand.u32 2147483648, %v420_v28  ;;  %v430_v17 = vand.u32 2147483647, %v420_v28 }
  0xe0   :  { %vm426_vm8 = vweird.f32 %v420_v28 }
  0xe1   :  { %v409_v38 = vsel %vm408_vm5, %v728_v21, %v405_v34  ;;  %v433_v23 = vor.u32 1.1754944e-38, %v432_v10  ;;  %vm431_vm10 = vcmp.eq.f32.partialorder %v430_v17, 8.507059e+37 }
  0xe2   :  { %v414_v40 = vsel %vm411_vm6, %v413_v37, %v409_v38 }
  0xe3   :  { %v437_v41 = vmul.f32 %v436_v36, %v414_v40 }
  0xe5   :  { %v732_v42 = vpop.eup %731  ;;  %v438_v46 = vadd.f32 %v437_v41, %v335_v44 }
  0xe6   :  { %v422_v45 = vmul.f32 %v732_v42, %v420_v28  ;;  %vm427_vm7 = vweird.f32 %v732_v42 }
  0xe7   :  { %733 = vtanh.f32 %v438_v46  ;;  %vm428_vm9 = vmor %vm426_vm8, %vm427_vm7 }
  0xe8   :  { %v423_v48 = vsub.f32 1.0, %v422_v45 }
  0xea   :  { %v424_v13 = vmul.f32 %v732_v42, %v423_v48 }
  0xec   :  { %v425_v19 = vadd.f32 %v732_v42, %v424_v13 }
  0xed   :  { %v734_v27 = vpop.eup %733 }
  0xee   :  { %v429_v31 = vsel %vm428_vm9, %v732_v42, %v425_v19  ;;  %v440_v35 = vsub.f32 0.0, %v734_v27 }
  0xef   :  { %v434_v39 = vsel %vm431_vm10, %v433_v23, %v429_v31 }
  0xf0   :  { %v441_v43 = vmul.f32 %v440_v35, %v434_v39 }
  0xf2   :  { %v442_v50 = vadd.f32 %v734_v27, %v441_v43 }
  0xf4   :  { %469 = vmatmul.f32.vlgmr.msrb.gmra.mxu2 %v442_v50  ;;  %489 = vmatmul.f32.vlgmr.msrb.gmra.mxu3 %v442_v50  ;;  %v443_v51 = vpack.c.bf16 %v442_v50, %v442_v50 }
  0xf5   :  { %509 = vmatmul.f32.vlgmr.msra.gmra.mxu0 %v442_v50 }
  0xf6   :  { %445 = vst.msk [vmem:[#allocation11] sm:$0xf] %vm444_vm11, %v443_v51 }
  0xf7   :  { %448 = vst.msk [vmem:[#allocation11 + $0x8] sm:$0xf] %vm447_vm12, %v443_v51 }
 0x177   :  { %v470_v52 = vpop.f32.mrf.mxu2  ;;  %v490_v53 = vpop.f32.mrf.mxu3 }
 0x178   :  { %v513_v55 = vadd.f32 %v470_v52, %v1181_v47  ;;  %v533_v57 = vadd.f32 %v490_v53, %v1183_v49  ;;  %v510_v49 = vpop.f32.mrf.mxu0 }
 0x179   :  { %v553_v22 = vadd.f32 %v1220_v26, %v510_v49 }
 0x17a   :  { %v706_v59 = vmul.f32 -1.442695, %v513_v55  ;;  %v707_v60 = vmul.f32 -1.442695, %v533_v57 }
 0x17c   :  { %735 = vpow2.f32 %v706_v59 }
 0x17d   :  { %737 = vpow2.f32 %v707_v60 }
 0x182   :  { %v736_v61 = vpop.eup %735 }
 0x183   :  { %v738_v0 = vpop.eup %737  ;;  %v517_v1 = vadd.f32 1.0, %v736_v61 }
 0x184   :  { %v537_v2 = vadd.f32 1.0, %v738_v0 }
 0x185   :  { %739 = vrcp.f32 %v517_v1  ;;  %v529_v12 = vand.u32 2147483648, %v517_v1  ;;  %v527_v47 = vand.u32 2147483647, %v517_v1  ;;  %vm523_vm14 = vweird.f32 %v517_v1 }
 0x186   :  { %741 = vrcp.f32 %v537_v2  ;;  %v549_v33 = vand.u32 2147483648, %v537_v2  ;;  %vm543_vm4 = vweird.f32 %v537_v2  ;;  %v547_v34 = vand.u32 2147483647, %v537_v2 }
 0x187   :  { %v530_v20 = vor.u32 1.1754944e-38, %v529_v12  ;;  %vm528_vm0 = vcmp.eq.f32.partialorder %v527_v47, 8.507059e+37 }
 0x188   :  { %v550_v38 = vor.u32 1.1754944e-38, %v549_v33  ;;  %vm548_vm6 = vcmp.eq.f32.partialorder %v547_v34, 8.507059e+37 }
 0x18b   :  { %v740_v4 = vpop.eup %739 }
 0x18c   :  { %v742_v5 = vpop.eup %741  ;;  %v519_v7 = vmul.f32 %v740_v4, %v517_v1  ;;  %vm524_vm13 = vweird.f32 %v740_v4 }
 0x18d   :  { %v539_v15 = vmul.f32 %v742_v5, %v537_v2  ;;  %vm525_vm15 = vmor %vm523_vm14, %vm524_vm13  ;;  %vm544_vm3 = vweird.f32 %v742_v5 }
 0x18e   :  { %v520_v11 = vsub.f32 1.0, %v519_v7  ;;  %vm545_vm5 = vmor %vm543_vm4, %vm544_vm3 }
 0x18f   :  { %v540_v21 = vsub.f32 1.0, %v539_v15 }
 0x190   :  { %v521_v16 = vmul.f32 %v740_v4, %v520_v11 }
 0x191   :  { %v541_v29 = vmul.f32 %v742_v5, %v540_v21 }
 0x192   :  { %v522_v18 = vadd.f32 %v740_v4, %v521_v16 }
 0x193   :  { %v542_v32 = vadd.f32 %v742_v5, %v541_v29 }
 0x194   :  { %v526_v24 = vsel %vm525_vm15, %v740_v4, %v522_v18 }
 0x195   :  { %v531_v25 = vsel %vm528_vm0, %v530_v20, %v526_v24  ;;  %v546_v36 = vsel %vm545_vm5, %v742_v5, %v542_v32 }
 0x196   :  { %v554_v28 = vmul.f32 %v553_v22, %v531_v25  ;;  %v551_v41 = vsel %vm548_vm6, %v550_v38, %v546_v36 }
 0x198   :  { %v555_v30 = vadd.f32 %v554_v28, %v1199_v3 }
 0x19a   :  { %743 = vtanh.f32 %v555_v30 }
 0x1a0   :  { %v744_v37 = vpop.eup %743 }
 0x1a1   :  { %v557_v40 = vsub.f32 %v442_v50, %v744_v37 }
 0x1a3   :  { %v558_v42 = vmul.f32 %v557_v40, %v551_v41 }
 0x1a5   :  { %v559_v44 = vadd.f32 %v744_v37, %v558_v42 }
 0x1a7   :  { %589 = vmatmul.f32.vlgmr.msra.gmra.mxu1 %v559_v44  ;;  %609 = vmatmul.f32.vlgmr.msra.gmra.mxu2 %v559_v44  ;;  %v560_v45 = vpack.c.bf16 %v559_v44, %v559_v44 }
 0x1a8   :  { %629 = vmatmul.f32.vlgmr.msra.gmra.mxu3 %v559_v44 }
 0x1a9   :  { %562 = vst.msk [vmem:[#allocation11 + $0x4] sm:$0xf] %vm444_vm11, %v560_v45 }
 0x1aa   :  { %563 = vst.msk [vmem:[#allocation11 + $0x4] sm:$0xf] %vm447_vm12, %v560_v45 }
 0x224   :  { %v590_v3 = vpop.f32.mrf.mxu1 }
 0x225   :  { %v633_v46 = vadd.f32 %v590_v3, %v1193_v62 }
 0x227   :  { %v708_v48 = vmul.f32 -1.442695, %v633_v46 }
 0x229   :  { %745 = vpow2.f32 %v708_v48 }
 0x22a   :  { %v610_v10 = vpop.f32.mrf.mxu2 }
 0x22b   :  { %v653_v13 = vadd.f32 %v610_v10, %v571_v63  ;;  %v630_v52 = vpop.f32.mrf.mxu3 }
 0x22c   :  { %v673_v57 = vadd.f32 %v1220_v26, %v630_v52 }
 0x22d   :  { %v709_v17 = vmul.f32 -1.442695, %v653_v13 }
 0x22f   :  { %v746_v19 = vpop.eup %745  ;;  %747 = vpow2.f32 %v709_v17 }
 0x230   :  { %v637_v23 = vadd.f32 1.0, %v746_v19 }
 0x232   :  { %749 = vrcp.f32 %v637_v23  ;;  %v649_v43 = vand.u32 2147483648, %v637_v23  ;;  %v647_v51 = vand.u32 2147483647, %v637_v23  ;;  %vm643_vm1 = vweird.f32 %v637_v23 }
 0x234   :  { %v650_v58 = vor.u32 1.1754944e-38, %v649_v43  ;;  %vm648_vm9 = vcmp.eq.f32.partialorder %v647_v51, 8.507059e+37 }
 0x235   :  { %v748_v27 = vpop.eup %747 }
 0x236   :  { %v657_v31 = vadd.f32 1.0, %v748_v27 }
 0x238   :  { %v750_v35 = vpop.eup %749  ;;  %751 = vrcp.f32 %v657_v31  ;;  %v669_v2 = vand.u32 2147483648, %v657_v31  ;;  %vm663_vm13 = vweird.f32 %v657_v31  ;;  %v667_v4 = vand.u32 2147483647, %v657_v31 }
 0x239   :  { %v639_v39 = vmul.f32 %v750_v35, %v637_v23  ;;  %vm644_vm7 = vweird.f32 %v750_v35 }
 0x23a   :  { %vm645_vm8 = vmor %vm643_vm1, %vm644_vm7  ;;  %v670_v11 = vor.u32 1.1754944e-38, %v669_v2  ;;  %vm668_vm15 = vcmp.eq.f32.partialorder %v667_v4, 8.507059e+37 }
 0x23b   :  { %v640_v62 = vsub.f32 1.0, %v639_v39 }
 0x23d   :  { %v641_v50 = vmul.f32 %v750_v35, %v640_v62 }
 0x23e   :  { %v752_v54 = vpop.eup %751 }
 0x23f   :  { %v659_v53 = vmul.f32 %v752_v54, %v657_v31  ;;  %v642_v56 = vadd.f32 %v750_v35, %v641_v50  ;;  %vm664_vm10 = vweird.f32 %v752_v54 }
 0x240   :  { %vm665_vm14 = vmor %vm663_vm13, %vm664_vm10 }
 0x241   :  { %v660_v63 = vsub.f32 1.0, %v659_v53  ;;  %v646_v55 = vsel %vm645_vm8, %v750_v35, %v642_v56 }
 0x242   :  { %v651_v59 = vsel %vm648_vm9, %v650_v58, %v646_v55 }
 0x243   :  { %v674_v60 = vmul.f32 %v673_v57, %v651_v59  ;;  %v661_v61 = vmul.f32 %v752_v54, %v660_v63 }
 0x245   :  { %v675_v0 = vadd.f32 %v674_v60, %v572_v14  ;;  %v662_v1 = vadd.f32 %v752_v54, %v661_v61 }
 0x247   :  { %753 = vtanh.f32 %v675_v0  ;;  %v666_v5 = vsel %vm665_vm14, %v752_v54, %v662_v1 }
 0x248   :  { %v671_v12 = vsel %vm668_vm15, %v670_v11, %v666_v5 }
 0x24d   :  { %v754_v7 = vpop.eup %753 }
 0x24e   :  { %v677_v26 = vsub.f32 %v559_v44, %v754_v7 }
 0x250   :  { %v678_v15 = vmul.f32 %v677_v26, %v671_v12 }
 0x252   :  { %v679_v16 = vadd.f32 %v754_v7, %v678_v15 }
 0x254   :  { %v680_v6 = vpack.c.bf16 %v679_v16, %v679_v16 }
 0x256   :  { %681 = vst.msk [vmem:[#allocation11 + $0x8] sm:$0xf] %vm444_vm11, %v680_v6 }
 0x257   :  { %682 = vst.msk [vmem:[#allocation11] sm:$0xf] %vm447_vm12, %v680_v6 }
 0x258   :  { %695 = dma.vmem_to_hbm [thread:$0]  %s688_s15, 192, %s690_s18, [#allocation5], %s887_s30, %s887_s30, %s888_s6  }
 0x259   :  { %881 = dma.done.wait [#allocation5], 192  }
 0x25a   :  { %882 = vsyncadd [#allocation5], 4294967104 }
 0x25b   :  { %700 = vsyncpa [#allocation4], 1 }
 0x25c   :  { %701 = vsyncpa [#allocation7], 1 }
 0x25d   :  { %702 = vsyncpa [#allocation10], 1 }
 0x25e   :  { %703 = vsyncpa [#allocation5], 1 }

</bundles_post_ra>
